<compile_context>
chip_gen: v7x
topology: tpu7x:2x2x1
jax: 0.10.0
libtpu: 0.0.40
codegen_flags: <defaults>
</compile_context>

<pallas_src>
import functools

import numpy as np
import jax
import jax.numpy as jnp
from jax.experimental import pallas as pl
from jax.experimental.pallas import tpu as pltpu

SEED = 0


# ----------------------------- Pallas kernel ------------------------------- #

def _dropout_kernel(x_ref, m_ref, o_ref, *, inv_keep):
    x = x_ref[...]
    keep = m_ref[...] != 0                      # int8 mask -> bool (VPU compare)
    o_ref[...] = jnp.where(keep, x * inv_keep, jnp.zeros_like(x))


# ------------------------------ JAX wrapper -------------------------------- #

def _round_up(a, b):
    return (a + b - 1) // b * b


def _apply_dropout_mask(x, mask_i8, rate, *, tile_rows=128):
    """out = x * mask / (1 - rate), tiled Pallas call (mask given as int8)."""
    orig_shape = x.shape
    orig_dtype = x.dtype

    last = orig_shape[-1] if x.ndim >= 1 else 1
    x2 = x.reshape(-1, last)
    m2 = mask_i8.reshape(-1, last)
    R, C = x2.shape

    # Lane-dense last dim (multiple of 128); row tile multiple of 32 (int8 tiling).
    Cp = _round_up(C, 128)
    tm = min(_round_up(tile_rows, 32), _round_up(R, 32))
    Rp = _round_up(R, tm)
    if (Rp, Cp) != (R, C):
        x2 = jnp.pad(x2, ((0, Rp - R), (0, Cp - C)))
        m2 = jnp.pad(m2, ((0, Rp - R), (0, Cp - C)))

    inv_keep = float(1.0 / (1.0 - rate))
    grid = (Rp // tm,)

    itemsize = jnp.dtype(orig_dtype).itemsize
    out = pl.pallas_call(
        functools.partial(_dropout_kernel, inv_keep=inv_keep),
        out_shape=jax.ShapeDtypeStruct((Rp, Cp), orig_dtype),
        grid=grid,
        in_specs=[
            pl.BlockSpec((tm, Cp), lambda i: (i, 0)),   # x tile
            pl.BlockSpec((tm, Cp), lambda i: (i, 0)),   # mask tile (int8)
        ],
        out_specs=pl.BlockSpec((tm, Cp), lambda i: (i, 0)),
        compiler_params=pltpu.CompilerParams(
            dimension_semantics=("parallel",),          # megacore on v7x
        ),
        cost_estimate=pl.CostEstimate(
            flops=2 * Rp * Cp,                          # mul + select per element
            transcendentals=0,
            bytes_accessed=Rp * Cp * (2 * itemsize + 1),
        ),
    )(x2, m2)

    return out[:R, :C].reshape(orig_shape)


def dropout_pt_forward(x, rate, offset=0, training=True):
    """Forward pass of Dropout_PT."""
    if (not training) or rate == 0:
        return x                                        # identity, like the module
    # Exact reproduction of the module's host-side numpy mask.
    np.random.seed(SEED + offset)
    mask_np = (np.random.uniform(size=x.shape) > rate)
    mask_i8 = jnp.asarray(mask_np.astype(np.int8))
    return _apply_dropout_mask(x, mask_i8, rate)


# ---------------------------------- main ----------------------------------- #

if __name__ == "__main__":
    N, F = 256, 128        # e.g. node-feature matrix the GCN feeds into dropout
    RATE = 0.5
    OFFSET = 0

    key = jax.random.PRNGKey(0)
    x = jax.random.normal(key, (N, F), dtype=jnp.float32)

    # eval mode: identity (no kernel, matches the PyTorch early return)
    out_eval = dropout_pt_forward(x, RATE, offset=OFFSET, training=False)
    assert out_eval is x

    # training mode: numpy-seeded mask + Pallas masked-rescale kernel
    out = dropout_pt_forward(x, RATE, offset=OFFSET, training=True)
    jax.block_until_ready(out)

    # reference (same host mask, pure jnp)
    np.random.seed(SEED + OFFSET)
    ref_mask = (np.random.uniform(size=x.shape) > RATE).astype(np.float32)
    ref = x * jnp.asarray(ref_mask) / (1.0 - RATE)

    assert out.shape == x.shape, out.shape
    assert out.dtype == x.dtype, out.dtype
    assert jnp.allclose(out, ref, atol=1e-6, rtol=1e-6), "mismatch vs reference"

    print("KERNEL_OK")
</pallas_src>

<mosaic_0001>
module attributes {stable_mosaic.version = 11 : i64} {
  func.func @_dropout_kernel(%arg0: i32, %arg1: memref<128x128xf32, #tpu.memory_space<vmem>>, %arg2: memref<128x128xi8, #tpu.memory_space<vmem>>, %arg3: memref<128x128xf32, #tpu.memory_space<vmem>>) attributes {dimension_semantics = [#tpu.dimension_semantics<parallel>], iteration_bounds = array<i64: 2>, scalar_prefetch = 0 : i64, scratch_operands = 0 : i64, tpu.core_type = #tpu.core_type<tc>, window_params = [{transform_indices = @transform_0, window_bounds = array<i64: 128, 128>}, {transform_indices = @transform_1, window_bounds = array<i64: 128, 128>}, {transform_indices = @transform_2, window_bounds = array<i64: 128, 128>}]} {
    %c0 = arith.constant 0 : index
    %c0_0 = arith.constant 0 : index
    %0 = vector.load %arg1[%c0, %c0_0] : memref<128x128xf32, #tpu.memory_space<vmem>>, vector<128x128xf32>
    %c0_1 = arith.constant 0 : index
    %c0_2 = arith.constant 0 : index
    %1 = vector.load %arg2[%c0_1, %c0_2] : memref<128x128xi8, #tpu.memory_space<vmem>>, vector<128x128xi8>
    %c0_i8 = arith.constant 0 : i8
    %2 = vector.broadcast %c0_i8 : i8 to vector<128x128xi8>
    %3 = arith.cmpi ne, %1, %2 : vector<128x128xi8>
    %cst = arith.constant 2.000000e+00 : f32
    %4 = vector.broadcast %cst : f32 to vector<128x128xf32>
    %5 = arith.mulf %0, %4 : vector<128x128xf32>
    %cst_3 = arith.constant 0.000000e+00 : f32
    %6 = vector.broadcast %cst_3 : f32 to vector<128x128xf32>
    %7 = arith.select %3, %5, %6 : vector<128x128xi1>, vector<128x128xf32>
    %c0_4 = arith.constant 0 : index
    %c0_5 = arith.constant 0 : index
    %8 = vector.load %arg3[%c0_4, %c0_5] : memref<128x128xf32, #tpu.memory_space<vmem>>, vector<128x128xf32>
    tpu.vector_store %arg3[%c0_4, %c0_5], %7 {strides = array<i32>} : memref<128x128xf32, #tpu.memory_space<vmem>>, vector<128x128xf32>,
    return
  }
  func.func @transform_0(%arg0: i32) -> (i32, i32) {
    %c0_i32 = arith.constant 0 : i32
    %c0_i32_0 = arith.constant 0 : i32
    return %arg0, %c0_i32 : i32, i32
  }
  func.func @transform_1(%arg0: i32) -> (i32, i32) {
    %c0_i32 = arith.constant 0 : i32
    %c0_i32_0 = arith.constant 0 : i32
    return %arg0, %c0_i32 : i32, i32
  }
  func.func @transform_2(%arg0: i32) -> (i32, i32) {
    %c0_i32 = arith.constant 0 : i32
    %c0_i32_0 = arith.constant 0 : i32
    return %arg0, %c0_i32 : i32, i32
  }
}

</mosaic_0001>

<bundles_post_ra>
// kernel: tpu_custom_call.1
= control target key start
LH: loop header
LB: loop body
LE: loop exit
PB: predicated region body
PF: predicated region fallthrough
CT: control target
= control target key end

     0   :  { %7 = vsyncpa [#allocation3], 0  ;;  %s1032_s0 = inlined_call_operand.hbm [shape: f32[256,128], index: 0, kind: input, shape index: {}]   ;;  %s1033_s1 = inlined_call_operand.hbm [shape: s8[256,128], index: 1, kind: input, shape index: {}]   ;;  %s1034_s2 = inlined_call_operand.hbm [shape: f32[256,128], index: 2, kind: output, shape index: {}]  }
   0x1   :  { %9 = vsyncpa [#allocation3 + $0x1], 0 }
   0x2   :  { %10 = vsyncpa [#allocation6], 0 }
   0x3   :  { %12 = vsyncpa [#allocation6 + $0x1], 0 }
   0x4   :  { %13 = vsyncpa [#allocation4], 0 }
   0x5   :  { %15 = vsyncpa [#allocation4 + $0x1], 0  ;;  %s737_s9 = smov 0   ;;  %s739_s10 = smov 0  }
   0x6   :  { %s741_s11 = smov 0   ;;  %s743_s12 = smov 0  }
   0x7 LB: > { %s758_s13 = sadd.s32 4294967295, %s712_s12   ;;  %s505_s14 = sadd.s32 4294967294, %s712_s12   ;;  %s712_s12 = sphi %s743_s12, %s1050_s12   ;;  %s708_s11 = sphi %s741_s11, %s1049_s11   ;;  %s704_s10 = sphi %s739_s10, %s1048_s10   ;;  %s700_s9 = sphi %s737_s9, %s1047_s9  }
   0x8   : > { %s762_s15 = sadd.s32 1, %s712_s12   ;;  %s28_s16 = sadd.s32 1, %s708_s11 }
   0x9   : > { %s25_s17 = ssub.s32 %s712_s12, %s762_s15  ;;  %p35_p0 = scmp.ne.s32.totalorder %s708_s11, %s704_s10 }
   0xa   : > { %p26_p1 = scmp.eq.s32.totalorder %s25_s17, 0  ;;  %p36_p2 = scmp.eq.s32.totalorder %s712_s12, 0 }
   0xb   : > { %p41_p3 = scmp.ne.s32.totalorder %s704_s10, %s700_s9  ;;  %p42_p4 = scmp.eq.s32.totalorder %s758_s13, 0 }
   0xc   : > { %s774_s18 = scalar_select %p26_p1, %s708_s11, %s28_s16  }
   0xd   : > { %p776_p5 = por %p36_p2, %p35_p0  ;;  %p780_p6 = por %p42_p4, %p41_p3 }
   0xe   : > { %p91_p7 = scmp.eq.s32.totalorder %s758_s13, 1  ;;  %p97_p8 = scmp.eq.s32.totalorder %s505_s14, 1 }
   0xf   : > { %s1038_s20 = scalar_select %p780_p6, 1, 0 }
  0x10   : > { %p543_p10 = scmp.lt.s32.totalorder %s712_s12, 2  ;;  %p787_p11 = por %p91_p7, %p35_p0 }
  0x11   : > { %p791_p12 = por %p97_p8, %p41_p3  ;;  %s796_s23 = sand.u32 1, %s708_s11  }
  0x12   : > { %s1039_s21 = scalar_select %p787_p11, 1, 0 }
  0x13   : > { %s1040_s22 = scalar_select %p791_p12, 1, 0 }
  0x14   : > { %s523_s24 = sshll.u32 %s712_s12, 11  ;;  %s508_s25 = sshll.u32 %s796_s23, 7 }
  0x15   : > { %s803_s28 = scalar_lea.hbm %s1032_s0, %s523_s24  ;;  %s121_s29 = scalar_lea.vmem [#allocation2], %s508_s25 }
  0x16   : > { %s128_s30 = sshll.u32 %s121_s29, 4  ;;  %p807_p13 = pnand %p543_p10, %p776_p5  ;;  %s811_s30 = int_to_ptr.vmem [resolvable:$true] %s128_s30 }
  0x17   : > { %s118_s4 = scalar_lea.sflag [#allocation3], %s796_s23  ;;  %s582_s5 = scalar_lea.hbm %s803_s28, 2048 }
  0x18   : > { %p583_p0 = scmp.ne.s32.totalorder %s803_s28, %s582_s5  ;;  %p584_p1 = pneg %p807_p13 }
  0x19   : > { %s587_s8 = scalar_lea.hbm %s1032_s0, 4096  ;;  %p588_p4 = scmp.lt.u32.totalorder %s803_s28, %s1032_s0 }
  0x1a   : > { %p585_p2 = pnand %p584_p1, %p583_p0  ;;  %p589_p5 = scmp.lt.u32.totalorder %s587_s8, %s582_s5 }
  0x1b   : > { %p591_p8 = scmp.lt.u32.totalorder %s582_s5, %s803_s28 }
  0x1c   : > { %p586_p3 = pneg %p585_p2  ;;  %p590_p7 = por %p589_p5, %p588_p4 }
  0x1e   : > { %p592_p10 = por %p591_p8, %p590_p7 }
  0x20   : > { %p593_p9 = pnand %p592_p10, %p586_p3 }
  0x22   : > { %596 = shalt.err (!%p593_p9)
}
  0x23   : > { %s597_s17 = scalar_lea.vmem %s811_s30, 2048  ;;  %s714_s19 = smov [#allocation2]  }
  0x24   : > { %p598_p0 = scmp.ne.s32.totalorder %s811_s30, %s597_s17  ;;  %s602_s24 = sshll.u32 %s714_s19, 4  ;;  %s603_s24 = int_to_ptr.vmem [resolvable:$false] %s602_s24 }
  0x25   : > { %s604_s25 = scalar_lea.vmem %s603_s24, 4096  ;;  %p605_p11 = scmp.lt.s32.totalorder %s811_s30, %s603_s24 }
  0x26   : > { %p600_p2 = pnand %p598_p0, %p584_p1  ;;  %p606_p4 = scmp.lt.s32.totalorder %s604_s25, %s597_s17 }
  0x28   : > { %p601_p12 = pneg %p600_p2  ;;  %p607_p5 = por %p606_p4, %p605_p11 }
  0x2a   : > { %p608_p7 = pnand %p607_p5, %p601_p12 }
  0x2c   : > { %611 = shalt.err (!%p608_p7)
}
  0x2d   : > { %s715_s26 = smov 128   ;;  %s716_s27 = smov 8  }
  0x2e   : > { %535 = dma.hbm_to_vmem [thread:$0]  (!%p807_p13), %s803_s28, 2048, %s811_s30, %s118_s4, %s715_s26, %s715_s26, %s716_s27  }
  0x2f   : > { %p514_p9 = scmp.ge.s32.totalorder %s712_s12, 1  ;;  %p157_p11 = scmp.lt.s32.totalorder %s712_s12, 3 }
  0x30   : > { %s511_s29 = sshll.u32 %s796_s23, 5  ;;  %s524_s6 = sshll.u32 %s712_s12, 9 }
  0x31   : > { %p847_p12 = pnand %p514_p9, %p157_p11  ;;  %s142_s7 = scalar_lea.vmem [#allocation5], %s511_s29 }
  0x32   : > { %s149_s8 = sshll.u32 %s142_s7, 4  ;;  %s855_s17 = scalar_lea.hbm %s1033_s1, %s524_s6  ;;  %s857_s8 = int_to_ptr.vmem [resolvable:$true] %s149_s8 }
  0x33   : > { %s139_s28 = scalar_lea.sflag [#allocation6], %s796_s23  ;;  %s612_s30 = scalar_lea.hbm %s855_s17, 512 }
  0x34   : > { %p613_p3 = scmp.ne.s32.totalorder %s855_s17, %s612_s30  ;;  %s617_s24 = scalar_lea.hbm %s1033_s1, 1024 }
  0x35   : > { %p618_p0 = scmp.lt.u32.totalorder %s855_s17, %s1033_s1  ;;  %p619_p2 = scmp.lt.u32.totalorder %s617_s24, %s612_s30 }
  0x36   : > { %p615_p8 = pnand %p613_p3, %p584_p1  ;;  %p621_p5 = scmp.lt.u32.totalorder %s612_s30, %s855_s17 }
  0x37   : > { %p620_p4 = por %p619_p2, %p618_p0 }
  0x38   : > { %p616_p10 = pneg %p615_p8 }
  0x39   : > { %p622_p7 = por %p621_p5, %p620_p4 }
  0x3b   : > { %p623_p9 = pnand %p622_p7, %p616_p10 }
  0x3d   : > { %626 = shalt.err (!%p623_p9)
}
  0x3e   : > { %s627_s6 = scalar_lea.vmem %s857_s8, 512  ;;  %s717_s7 = smov [#allocation5]  }
  0x3f   : > { %p628_p11 = scmp.ne.s32.totalorder %s857_s8, %s627_s6  ;;  %s632_s14 = sshll.u32 %s717_s7, 4  ;;  %s633_s14 = int_to_ptr.vmem [resolvable:$false] %s632_s14 }
  0x40   : > { %s634_s16 = scalar_lea.vmem %s633_s14, 1024  ;;  %p635_p6 = scmp.lt.s32.totalorder %s857_s8, %s633_s14 }
  0x41   : > { %p630_p3 = pnand %p628_p11, %p584_p1  ;;  %p636_p0 = scmp.lt.s32.totalorder %s634_s16, %s627_s6 }
  0x43   : > { %p631_p8 = pneg %p630_p3  ;;  %p637_p2 = por %p636_p0, %p635_p6 }
  0x45   : > { %p638_p4 = pnand %p637_p2, %p631_p8 }
  0x47   : > { %641 = shalt.err (!%p638_p4)
}
  0x48   : > { %538 = dma.hbm_to_vmem [thread:$0]  (!%p807_p13), %s855_s17, 512, %s857_s8, %s139_s28, %s715_s26, %s715_s26, %s716_s27  }
  0x49   : > { %161 = sbr.rel (%p847_p12) target bundleno = 142 (0x8e), region = 28  ;;  %s891_s30 = sand.u32 (!%p847_p12), 1, %s704_s10  }
  0x4a   : > { %s515_s4 = sshll.u32 (!%p847_p12), %s891_s30, 7  ;;  %s164_s3 = scalar_lea.sflag (!%p847_p12), [#allocation3], %s891_s30 }
  0x4b   : > { %s897_s19 = scalar_lea.vmem (!%p847_p12), [#allocation2], %s515_s4  ;;  %p1043_p6 = scmp.ne.s32.totalorder (!%p847_p12), %s1038_s20, 0 }
  0x50   : > { %687 = dma.done.wait (%p1043_p6), %s164_s3, 2048  }
  0x51   : > { %689 = vsyncadd (%p1043_p6), %s164_s3, 4294965248  ;;  %s516_s23 = sshll.u32 %s891_s30, 5  ;;  %s173_s26 = scalar_lea.sflag [#allocation6], %s891_s30 }
  0x52   : > { %s905_s27 = scalar_lea.vmem [#allocation5], %s516_s23 }
  0x53   : > { %691 = dma.done.wait (%p1043_p6), %s173_s26, 512  }
  0x54   : > { %693 = vsyncadd (%p1043_p6), %s173_s26, 4294966784  ;;  %v207_v0 = vld [vmem:[%s897_s19] sm:$0xff]  ;;  %v208_v2 = vld [vmem:[%s897_s19 + $0x8] sm:$0xff]  ;;  %v718_v7 = vmov 0   ;;  %s936_s20 = scalar_lea.vmem [#allocation7], %s515_s4  ;;  %s525_s5 = sshll.u32 %s758_s13, 11 }
  0x55   : > { %v223_v1 = vld [vmem:[%s905_s27] sm:$0xff]  ;;  %v209_v3 = vld [vmem:[%s897_s19 + $0x10] sm:$0xff]  ;;  %v210_v4 = vld [vmem:[%s897_s19 + $0x18] sm:$0xff]  ;;  %v231_v6 = vmul.f32 2.0, %v207_v0  ;;  %v232_v9 = vmul.f32 2.0, %v208_v2  ;;  %s409_s8 = sshll.u32 %s936_s20, 4  ;;  %s985_s24 = scalar_lea.hbm %s1034_s2, %s525_s5  ;;  %s987_s8 = int_to_ptr.vmem [resolvable:$true] %s409_s8 }
  0x56   : > { %vm227_vm0 = vnez %v223_v1  ;;  %v211_v5 = vld [vmem:[%s897_s19 + $0x20] sm:$0xff]  ;;  %v224_v10 = vld [vmem:[%s905_s27 + $0x8] sm:$0xff]  ;;  %v213_v16 = vld [vmem:[%s897_s19 + $0x30] sm:$0xff]  ;;  %v233_v17 = vmul.f32 2.0, %v209_v3  ;;  %v234_v18 = vmul.f32 2.0, %v210_v4  ;;  %s396_s13 = scalar_lea.sflag [#allocation4], %s891_s30 }
  0x57   : > { %v247_v8 = vsel %vm227_vm0, 16843009, %v718_v7  ;;  %v212_v15 = vld [vmem:[%s897_s19 + $0x28] sm:$0xff]  ;;  %vm228_vm1 = vnez %v224_v10  ;;  %v921_v19 = vmul.f32 2.0, %v211_v5  ;;  %v225_v20 = vld [vmem:[%s905_s27 + $0x10] sm:$0xff]  ;;  %v927_v27 = vmul.f32 2.0, %v213_v16 }
  0x58   : > { %v251_v11 = vunpack.c.0.s8 %v247_v8  ;;  %v252_v12 = vunpack.c.1.s8 %v247_v8  ;;  %v253_v13 = vunpack.c.2.s8 %v247_v8  ;;  %v254_v14 = vunpack.c.3.s8 %v247_v8  ;;  %v214_v48 = vld [vmem:[%s897_s19 + $0x38] sm:$0xff]  ;;  %v215_v0 = vld [vmem:[%s897_s19 + $0x40] sm:$0xff]  ;;  %s642_s25 = scalar_lea.vmem %s987_s8, 2048  ;;  %p1044_p1 = scmp.ne.s32.totalorder %s1039_s21, 0 }
  0x59   : > { %v248_v25 = vsel %vm228_vm1, 16843009, %v718_v7  ;;  %v925_v26 = vmul.f32 2.0, %v212_v15  ;;  %vm229_vm2 = vnez %v225_v20  ;;  %v238_v57 = vmul.f32 2.0, %v214_v48  ;;  %p643_p13 = scmp.ne.s32.totalorder %s987_s8, %s642_s25  ;;  %s719_s29 = smov [#allocation7]  }
  0x5a   : > { %v267_v21 = vpack.c.b16 %v251_v11, %v251_v11  ;;  %v269_v22 = vpack.c.b16 %v252_v12, %v252_v12  ;;  %v271_v23 = vpack.c.b16 %v253_v13, %v253_v13  ;;  %v273_v24 = vpack.c.b16 %v254_v14, %v254_v14  ;;  %v216_v11 = vld [vmem:[%s897_s19 + $0x48] sm:$0xff]  ;;  %v217_v12 = vld [vmem:[%s897_s19 + $0x50] sm:$0xff]  ;;  %v226_v14 = vld [vmem:[%s905_s27 + $0x18] sm:$0xff]  ;;  %s646_s6 = sshll.u32 %s719_s29, 4  ;;  %s647_s6 = int_to_ptr.vmem [resolvable:$false] %s646_s6 }
  0x5b   : > { %v255_v32 = vunpack.c.0.s8 %v248_v25  ;;  %v256_v33 = vunpack.c.1.s8 %v248_v25  ;;  %v257_v34 = vunpack.c.2.s8 %v248_v25  ;;  %v258_v35 = vunpack.c.3.s8 %v248_v25  ;;  %p644_p12 = pnand %p643_p13, %p1044_p1  ;;  %s648_s7 = scalar_lea.vmem %s647_s6, 4096 }
  0x5c   : > { %v268_v28 = vpack.c.b8 %v267_v21, %v267_v21  ;;  %v270_v29 = vpack.c.b8 %v269_v22, %v269_v22  ;;  %v272_v30 = vpack.c.b8 %v271_v23, %v271_v23  ;;  %v274_v31 = vpack.c.b8 %v273_v24, %v273_v24  ;;  %v218_v21 = vld [vmem:[%s897_s19 + $0x58] sm:$0xff]  ;;  %p649_p5 = scmp.lt.s32.totalorder %s987_s8, %s647_s6  ;;  %p650_p7 = scmp.lt.s32.totalorder %s648_s7, %s642_s25 }
  0x5d   : > { %v275_v39 = vpack.c.b16 %v255_v32, %v255_v32  ;;  %v277_v46 = vpack.c.b16 %v256_v33, %v256_v33  ;;  %v279_v47 = vpack.c.b16 %v257_v34, %v257_v34  ;;  %v281_v49 = vpack.c.b16 %v258_v35, %v258_v35  ;;  %p645_p10 = pneg %p644_p12 }
  0x5e   : > { %vm299_vm3 = vnez %v268_v28  ;;  %vm300_vm4 = vnez %v270_v29  ;;  %vm301_vm5 = vnez %v272_v30  ;;  %vm302_vm6 = vnez %v274_v31  ;;  %p651_p9 = por %p650_p7, %p649_p5 }
  0x5f   : > { %v315_v36 = vsel %vm299_vm3, 16843009, %v718_v7  ;;  %v316_v37 = vsel %vm300_vm4, 16843009, %v718_v7  ;;  %v317_v38 = vsel %vm301_vm5, 16843009, %v718_v7  ;;  %v276_v45 = vpack.c.b8 %v275_v39, %v275_v39 }
  0x60   : > { %v331_v40 = vunpack.c.0.s8 %v315_v36  ;;  %v332_v41 = vunpack.c.0.s8 %v316_v37  ;;  %v333_v42 = vunpack.c.0.s8 %v317_v38  ;;  %v318_v43 = vsel %vm302_vm6, 16843009, %v718_v7  ;;  %p652_p11 = pnand %p651_p9, %p645_p10 }
  0x61   : > { %v334_v44 = vunpack.c.0.s8 %v318_v43  ;;  %vm303_vm11 = vnez %v276_v45  ;;  %v278_v54 = vpack.c.b8 %v277_v46, %v277_v46  ;;  %v280_v55 = vpack.c.b8 %v279_v47, %v279_v47 }
  0x62   : > { %vm347_vm7 = vcmp.ne.s32.totalorder %v331_v40, 0  ;;  %vm348_vm8 = vcmp.ne.s32.totalorder %v332_v41, 0  ;;  %vm349_vm9 = vcmp.ne.s32.totalorder %v333_v42, 0  ;;  %v319_v56 = vsel %vm303_vm11, 16843009, %v718_v7  ;;  %v219_v42 = vld [vmem:[%s897_s19 + $0x60] sm:$0xff] }
  0x63   : > { %v363_v50 = vsel %vm347_vm7, %v231_v6, 0.0  ;;  %v364_v51 = vsel %vm348_vm8, %v232_v9, 0.0  ;;  %v365_v52 = vsel %vm349_vm9, %v233_v17, 0.0  ;;  %vm350_vm10 = vcmp.ne.s32.totalorder %v334_v44, 0  ;;  %v220_v44 = vld [vmem:[%s897_s19 + $0x68] sm:$0xff] }
  0x64   : > { %379 = vst [vmem:[%s936_s20] sm:$0xff] %v363_v50  ;;  %380 = vst [vmem:[%s936_s20 + $0x8] sm:$0xff] %v364_v51  ;;  %v366_v53 = vsel %vm350_vm10, %v234_v18, 0.0  ;;  %v282_v58 = vpack.c.b8 %v281_v49, %v281_v49  ;;  %v249_v59 = vsel %vm229_vm2, 16843009, %v718_v7  ;;  %v335_v60 = vunpack.c.0.s8 %v319_v56  ;;  %v221_v51 = vld [vmem:[%s897_s19 + $0x70] sm:$0xff] }
  0x65   : > { %381 = vst [vmem:[%s936_s20 + $0x10] sm:$0xff] %v365_v52  ;;  %382 = vst [vmem:[%s936_s20 + $0x18] sm:$0xff] %v366_v53  ;;  %vm304_vm12 = vnez %v278_v54  ;;  %vm305_vm13 = vnez %v280_v55  ;;  %v259_v61 = vunpack.c.0.s8 %v249_v59  ;;  %v260_v1 = vunpack.c.1.s8 %v249_v59 }
  0x66   : > { %v320_v62 = vsel %vm304_vm12, 16843009, %v718_v7  ;;  %v321_v63 = vsel %vm305_vm13, 16843009, %v718_v7  ;;  %vm306_vm14 = vnez %v282_v58  ;;  %vm351_vm15 = vcmp.ne.s32.totalorder %v335_v60, 0 }
  0x67   : > { %v336_v2 = vunpack.c.0.s8 %v320_v62  ;;  %v337_v3 = vunpack.c.0.s8 %v321_v63  ;;  %v322_v4 = vsel %vm306_vm14, 16843009, %v718_v7  ;;  %v367_v5 = vsel %vm351_vm15, %v921_v19, 0.0 }
  0x68   : > { %v338_v6 = vunpack.c.0.s8 %v322_v4  ;;  %v283_v8 = vpack.c.b16 %v259_v61, %v259_v61  ;;  %v285_v9 = vpack.c.b16 %v260_v1, %v260_v1  ;;  %383 = vst [vmem:[%s936_s20 + $0x20] sm:$0xff] %v367_v5  ;;  %v239_v10 = vmul.f32 2.0, %v215_v0  ;;  %v222_v61 = vld [vmem:[%s897_s19 + $0x78] sm:$0xff] }
  0x69   : > { %vm352_vm0 = vcmp.ne.s32.totalorder %v336_v2, 0  ;;  %vm353_vm1 = vcmp.ne.s32.totalorder %v337_v3, 0  ;;  %v261_v13 = vunpack.c.2.s8 %v249_v59  ;;  %v262_v22 = vunpack.c.3.s8 %v249_v59 }
  0x6a   : > { %v368_v15 = vsel %vm352_vm0, %v925_v26, 0.0  ;;  %v369_v16 = vsel %vm353_vm1, %v927_v27, 0.0  ;;  %vm354_vm2 = vcmp.ne.s32.totalorder %v338_v6, 0  ;;  %v284_v17 = vpack.c.b8 %v283_v8, %v283_v8 }
  0x6b   : > { %384 = vst [vmem:[%s936_s20 + $0x28] sm:$0xff] %v368_v15  ;;  %385 = vst [vmem:[%s936_s20 + $0x30] sm:$0xff] %v369_v16  ;;  %v370_v18 = vsel %vm354_vm2, %v238_v57, 0.0  ;;  %v286_v19 = vpack.c.b8 %v285_v9, %v285_v9  ;;  %v287_v20 = vpack.c.b16 %v261_v13, %v261_v13  ;;  %v240_v23 = vmul.f32 2.0, %v216_v11 }
  0x6c   : > { %386 = vst [vmem:[%s936_s20 + $0x38] sm:$0xff] %v370_v18  ;;  %vm307_vm3 = vnez %v284_v17  ;;  %v241_v24 = vmul.f32 2.0, %v217_v12  ;;  %vm230_vm4 = vnez %v226_v14  ;;  %v289_v28 = vpack.c.b16 %v262_v22, %v262_v22 }
  0x6d   : > { %v323_v25 = vsel %vm307_vm3, 16843009, %v718_v7  ;;  %vm308_vm5 = vnez %v286_v19  ;;  %v288_v26 = vpack.c.b8 %v287_v20, %v287_v20  ;;  %v242_v30 = vmul.f32 2.0, %v218_v21 }
  0x6e   : > { %v339_v27 = vunpack.c.0.s8 %v323_v25  ;;  %v324_v29 = vsel %vm308_vm5, 16843009, %v718_v7  ;;  %v250_v31 = vsel %vm230_vm4, 16843009, %v718_v7  ;;  %v290_v33 = vpack.c.b8 %v289_v28, %v289_v28 }
  0x6f   : > { %v340_v32 = vunpack.c.0.s8 %v324_v29  ;;  %vm309_vm6 = vnez %v288_v26  ;;  %v263_v34 = vunpack.c.0.s8 %v250_v31  ;;  %v264_v36 = vunpack.c.1.s8 %v250_v31 }
  0x70   : > { %vm355_vm7 = vcmp.ne.s32.totalorder %v339_v27, 0  ;;  %v325_v35 = vsel %vm309_vm6, 16843009, %v718_v7  ;;  %v265_v37 = vunpack.c.2.s8 %v250_v31  ;;  %vm310_vm9 = vnez %v290_v33 }
  0x71   : > { %v371_v38 = vsel %vm355_vm7, %v239_v10, 0.0  ;;  %vm356_vm8 = vcmp.ne.s32.totalorder %v340_v32, 0  ;;  %v341_v39 = vunpack.c.0.s8 %v325_v35  ;;  %v326_v41 = vsel %vm310_vm9, 16843009, %v718_v7 }
  0x72   : > { %387 = vst [vmem:[%s936_s20 + $0x40] sm:$0xff] %v371_v38  ;;  %v372_v40 = vsel %vm356_vm8, %v240_v23, 0.0  ;;  %v291_v43 = vpack.c.b16 %v263_v34, %v263_v34  ;;  %v293_v45 = vpack.c.b16 %v264_v36, %v264_v36  ;;  %v342_v46 = vunpack.c.0.s8 %v326_v41 }
  0x73   : > { %388 = vst [vmem:[%s936_s20 + $0x48] sm:$0xff] %v372_v40  ;;  %vm357_vm10 = vcmp.ne.s32.totalorder %v341_v39, 0  ;;  %v295_v47 = vpack.c.b16 %v265_v37, %v265_v37  ;;  %v266_v52 = vunpack.c.3.s8 %v250_v31  ;;  %v243_v53 = vmul.f32 2.0, %v219_v42 }
  0x74   : > { %v373_v48 = vsel %vm357_vm10, %v241_v24, 0.0  ;;  %v292_v49 = vpack.c.b8 %v291_v43, %v291_v43  ;;  %v294_v50 = vpack.c.b8 %v293_v45, %v293_v45  ;;  %vm358_vm11 = vcmp.ne.s32.totalorder %v342_v46, 0 }
  0x75   : > { %389 = vst [vmem:[%s936_s20 + $0x50] sm:$0xff] %v373_v48  ;;  %v244_v54 = vmul.f32 2.0, %v220_v44  ;;  %v296_v55 = vpack.c.b8 %v295_v47, %v295_v47  ;;  %v374_v56 = vsel %vm358_vm11, %v242_v30, 0.0  ;;  %v297_v57 = vpack.c.b16 %v266_v52, %v266_v52 }
  0x76   : > { %vm311_vm12 = vnez %v292_v49  ;;  %vm312_vm13 = vnez %v294_v50  ;;  %390 = vst [vmem:[%s936_s20 + $0x58] sm:$0xff] %v374_v56  ;;  %v245_v60 = vmul.f32 2.0, %v221_v51  ;;  %v246_v3 = vmul.f32 2.0, %v222_v61 }
  0x77   : > { %v327_v58 = vsel %vm311_vm12, 16843009, %v718_v7  ;;  %v328_v59 = vsel %vm312_vm13, 16843009, %v718_v7  ;;  %vm313_vm14 = vnez %v296_v55  ;;  %v298_v1 = vpack.c.b8 %v297_v57, %v297_v57 }
  0x78   : > { %v343_v62 = vunpack.c.0.s8 %v327_v58  ;;  %v344_v63 = vunpack.c.0.s8 %v328_v59  ;;  %v329_v0 = vsel %vm313_vm14, 16843009, %v718_v7 }
  0x79   : > { %v345_v2 = vunpack.c.0.s8 %v329_v0  ;;  %vm314_vm1 = vnez %v298_v1 }
  0x7a   : > { %vm359_vm15 = vcmp.ne.s32.totalorder %v343_v62, 0  ;;  %vm360_vm0 = vcmp.ne.s32.totalorder %v344_v63, 0  ;;  %v330_v6 = vsel %vm314_vm1, 16843009, %v718_v7 }
  0x7b   : > { %v375_v4 = vsel %vm359_vm15, %v243_v53, 0.0  ;;  %v376_v5 = vsel %vm360_vm0, %v244_v54, 0.0  ;;  %vm361_vm2 = vcmp.ne.s32.totalorder %v345_v2, 0  ;;  %v346_v9 = vunpack.c.0.s8 %v330_v6 }
  0x7c   : > { %391 = vst [vmem:[%s936_s20 + $0x60] sm:$0xff] %v375_v4  ;;  %392 = vst [vmem:[%s936_s20 + $0x68] sm:$0xff] %v376_v5  ;;  %v377_v8 = vsel %vm361_vm2, %v245_v60, 0.0 }
  0x7d   : > { %393 = vst [vmem:[%s936_s20 + $0x70] sm:$0xff] %v377_v8  ;;  %vm362_vm3 = vcmp.ne.s32.totalorder %v346_v9, 0 }
  0x7e   : > { %v378_v10 = vsel %vm362_vm3, %v246_v3, 0.0 }
  0x7f   : > { %394 = vst [vmem:[%s936_s20 + $0x78] sm:$0xff] %v378_v10 }
  0x80   : > { %655 = shalt.err (!%p652_p11)
}
  0x81   : > { %s656_s14 = scalar_lea.hbm %s985_s24, 2048  ;;  %s660_s3 = scalar_lea.hbm %s1034_s2, 4096 }
  0x82   : > { %p657_p3 = scmp.ne.s32.totalorder %s985_s24, %s656_s14  ;;  %p661_p2 = scmp.lt.u32.totalorder %s985_s24, %s1034_s2 }
  0x83   : > { %p662_p4 = scmp.lt.u32.totalorder %s660_s3, %s656_s14  ;;  %p664_p13 = scmp.lt.u32.totalorder %s656_s14, %s985_s24 }
  0x84   : > { %p658_p8 = pnand %p657_p3, %p1044_p1 }
  0x85   : > { %p663_p6 = por %p662_p4, %p661_p2 }
  0x86   : > { %p659_p0 = pneg %p658_p8 }
  0x87   : > { %p665_p12 = por %p664_p13, %p663_p6 }
  0x89   : > { %p666_p10 = pnand %p665_p12, %p659_p0 }
  0x8b   : > { %669 = shalt.err (!%p666_p10)
}
  0x8c   : > { %s720_s26 = smov 128   ;;  %s721_s27 = smov 8  }
  0x8d   : > { %530 = dma.vmem_to_hbm [thread:$0]  (%p1044_p1), %s987_s8, 2048, %s985_s24, %s396_s13, %s720_s26, %s720_s26, %s721_s27  }
  0x8e PF: > { %s424_s20 = sand.u32 1, %s700_s9   ;;  %p1045_p5 = scmp.ne.s32.totalorder %s1040_s22, 0 }
  0x8f   : > { %p1046_p7 = scmp.ge.s32.totalorder %s712_s12, 2  ;;  %s425_s5 = scalar_lea.sflag [#allocation4], %s424_s20 }
  0x91   : > { %p540_p9 = pnand %p1046_p7, %p1045_p5 }
  0x93   : > { %695 = dma.done.wait (!%p540_p9), %s425_s5, 2048  }
  0x94   : > { %697 = vsyncadd (!%p540_p9), %s425_s5, 4294965248  ;;  %p18_p11 = scmp.ge.s32.totalorder %s762_s15, 4   ;;  %s1047_s9 = smov %s704_s10 }
  0x95   : > { %s1048_s10 = smov %s708_s11  ;;  %s1049_s11 = smov %s774_s18 }
  0x96   : > { %s1050_s12 = smov %s762_s15  ;;  %20 = sbr.rel (!%p18_p11) target bundleno = 7 (0x7), region = 86 }
  0x9d   :  { %430 = vsyncpa [#allocation3], 1 }
  0x9e   :  { %432 = vsyncpa [#allocation3 + $0x1], 1 }
  0x9f   :  { %433 = vsyncpa [#allocation6], 1 }
  0xa0   :  { %435 = vsyncpa [#allocation6 + $0x1], 1 }
  0xa1   :  { %436 = vsyncpa [#allocation4], 1 }
  0xa2   :  { %438 = vsyncpa [#allocation4 + $0x1], 1 }

</bundles_post_ra>
